<compile_context>
chip_gen: v7x
topology: tpu7x:2x2x1
jax: 0.10.0
libtpu: 0.0.40
codegen_flags: <defaults>
</compile_context>

<pallas_src>
import functools

import jax
import jax.numpy as jnp
from jax.experimental import pallas as pl
from jax.experimental.pallas import tpu as pltpu


def _tracknet_loss_kernel(packed_ref, out_ref, *, alpha):
    p = packed_ref[...]                         # (16, N) channels-first packed slab

    # channel map: 0:3 c1 | 3:6 c2 | 6:9 tgt | 9:12 tgt_shift | 12 r1 | 13 r2 | 14 m1 | 15 m2
    r1 = p[12:13, :]                            # (1, N)
    r2 = p[13:14, :]                            # (1, N)
    inv_r1 = pl.reciprocal(r1, approx=False)    # 1 recip + 3 muls (vs 3 divides)
    inv_r2 = pl.reciprocal(r2, approx=False)

    # ---- PointInAreaLoss (unrolled xyz, no cross-sublane reduce) ----
    d1x = (p[0:1, :] - p[6:7, :]) * inv_r1
    d1y = (p[1:2, :] - p[7:8, :]) * inv_r1
    d1z = (p[2:3, :] - p[8:9, :]) * inv_r1
    t1 = jnp.sqrt(d1x * d1x + d1y * d1y + d1z * d1z)        # (1, N)

    d2x = (p[3:4, :] - p[9:10, :]) * inv_r2
    d2y = (p[4:5, :] - p[10:11, :]) * inv_r2
    d2z = (p[5:6, :] - p[11:12, :]) * inv_r2
    t2 = jnp.sqrt(d2x * d2x + d2y * d2y + d2z * d2z)        # (1, N); last lane of each
                                                            # batch is garbage, masked out

    # ---- AreaSizeLoss ----
    a1 = r1 * r1
    a2 = r2 * r2

    # ---- Combine + masked mean, emitted as a single scalar ----
    m1 = p[14:15, :]
    m2 = p[15:16, :]

    l1 = alpha * t1 + (1.0 - alpha) * a1
    l2 = alpha * t2 + (1.0 - alpha) * a2

    num = jnp.sum(l1 * m1 + l2 * m2)
    den = jnp.sum(m1 + m2)
    out_ref[0] = num / den


@functools.partial(jax.jit, static_argnames=("alpha",))
def tracknet_loss_pallas(preds, targets, target_mask, alpha=0.9):
    """preds: dict with coords_t1 (B,S,3), radius_t1 (B,S,1),
                        coords_t2 (B,S,3), radius_t2 (B,S,1)
       targets: (B,S,3), target_mask: (B, 2S-1) bool
       returns scalar f32 (masked mean of the combined loss)."""
    if alpha > 1 or alpha < 0:
        raise ValueError(f"alpha must be in [0, 1], got {alpha}")
    if preds['coords_t1'].shape[0] != targets.shape[0]:
        raise ValueError("Shape mismatch! preds and targets batch sizes differ.")
    if targets.shape[-1] < 3:
        raise ValueError("Target must be 3-dimensional (x, y, z).")

    f32 = jnp.float32
    B, S, _ = targets.shape
    tgt = targets.astype(f32)

    # mask (B, 2S-1) -> two (B, S) rows: t1 mask, t2 mask with last position zeroed
    m = target_mask.astype(f32)
    m1 = m[:, :S]                                        # (B, S)
    m2 = jnp.pad(m[:, S:], ((0, 0), (0, 1)))             # (B, S), last lane = 0

    # Single producer fusion: one concat + one reshape/transpose into a (16, B*S)
    # lane-dense channels-first slab (the ONLY pallas_call operand).
    packed = jnp.concatenate(
        [preds['coords_t1'].astype(f32),                 # 0:3
         preds['coords_t2'].astype(f32),                 # 3:6
         tgt,                                            # 6:9
         jnp.roll(tgt, shift=-1, axis=1),                # 9:12  tgt[:, i+1] at pos i
         preds['radius_t1'].astype(f32),                 # 12
         preds['radius_t2'].astype(f32),                 # 13
         m1[..., None],                                  # 14
         m2[..., None]],                                 # 15
        axis=-1)                                         # (B, S, 16)
    packed = packed.reshape(B * S, 16).T                 # (16, B*S)

    out = pl.pallas_call(
        functools.partial(_tracknet_loss_kernel, alpha=float(alpha)),
        out_shape=jax.ShapeDtypeStruct((1,), jnp.float32),
        in_specs=[pl.BlockSpec(memory_space=pltpu.MemorySpace.VMEM)],
        out_specs=pl.BlockSpec(memory_space=pltpu.MemorySpace.SMEM),
    )(packed)

    return out[0]


def tracknet_loss_ref(preds, targets, target_mask, alpha=0.9):
    """Pure-JAX reference mirroring the PyTorch module exactly."""
    t1_diff = preds['coords_t1'] - targets
    t2_diff = preds['coords_t2'][:, :-1] - targets[:, 1:]
    t1 = jnp.linalg.norm(t1_diff / preds['radius_t1'], axis=-1)
    t2 = jnp.linalg.norm(t2_diff / preds['radius_t2'][:, :-1], axis=-1)
    points_in_area = jnp.concatenate([t1, t2], axis=1)

    r1_loss = preds['radius_t1'][:, :, 0] ** 2
    r2_loss = preds['radius_t2'][:, :-1, 0] ** 2
    area_size = jnp.concatenate([r1_loss, r2_loss], axis=1)

    loss = alpha * points_in_area + (1.0 - alpha) * area_size
    mf = target_mask.astype(jnp.float32)
    return (jnp.sum(loss * mf) / jnp.sum(mf)).astype(jnp.float32)


if __name__ == "__main__":
    B, S = 2, 8
    key = jax.random.PRNGKey(0)
    k1, k2, k3, k4, k5, k6 = jax.random.split(key, 6)

    preds = {
        'coords_t1': jax.random.normal(k1, (B, S, 3), dtype=jnp.float32),
        'coords_t2': jax.random.normal(k2, (B, S, 3), dtype=jnp.float32),
        # radii must be positive / nonzero (they divide the coord error)
        'radius_t1': jnp.abs(jax.random.normal(k3, (B, S, 1), dtype=jnp.float32)) + 0.1,
        'radius_t2': jnp.abs(jax.random.normal(k4, (B, S, 1), dtype=jnp.float32)) + 0.1,
    }
    targets = jax.random.normal(k5, (B, S, 3), dtype=jnp.float32)
    target_mask = jax.random.bernoulli(k6, p=0.7, shape=(B, 2 * S - 1))
    # make sure at least one valid position exists (all-False mask -> NaN, same as torch)
    target_mask = target_mask.at[0, 0].set(True)

    out = tracknet_loss_pallas(preds, targets, target_mask, alpha=0.9)
    out = jax.block_until_ready(out)

    ref = tracknet_loss_ref(preds, targets, target_mask, alpha=0.9)
    assert jnp.allclose(out, ref, rtol=1e-5, atol=1e-5), (out, ref)
    print("KERNEL_OK")
</pallas_src>

<mosaic_0001>
module attributes {stable_mosaic.version = 11 : i64} {
  func.func @_tracknet_loss_kernel(%arg0: memref<16x16xf32, #tpu.memory_space<vmem>>, %arg1: memref<1xf32, #tpu.memory_space<smem>>) attributes {dimension_semantics = [], scalar_prefetch = 0 : i64, scratch_operands = 0 : i64, tpu.core_type = #tpu.core_type<tc>} {
    %c0 = arith.constant 0 : index
    %c0_0 = arith.constant 0 : index
    %0 = vector.load %arg0[%c0, %c0_0] : memref<16x16xf32, #tpu.memory_space<vmem>>, vector<16x16xf32>
    %1 = vector.extract_strided_slice %0 {offsets = [12, 0], sizes = [1, 16], strides = [1, 1]} : vector<16x16xf32> to vector<1x16xf32>
    %2 = vector.extract_strided_slice %0 {offsets = [13, 0], sizes = [1, 16], strides = [1, 1]} : vector<16x16xf32> to vector<1x16xf32>
    %3 = tpu.reciprocal %1 : vector<1x16xf32> -> vector<1x16xf32>
    %4 = tpu.reciprocal %2 : vector<1x16xf32> -> vector<1x16xf32>
    %5 = vector.extract_strided_slice %0 {offsets = [0, 0], sizes = [1, 16], strides = [1, 1]} : vector<16x16xf32> to vector<1x16xf32>
    %6 = vector.extract_strided_slice %0 {offsets = [6, 0], sizes = [1, 16], strides = [1, 1]} : vector<16x16xf32> to vector<1x16xf32>
    %7 = arith.subf %5, %6 : vector<1x16xf32>
    %8 = arith.mulf %7, %3 : vector<1x16xf32>
    %9 = vector.extract_strided_slice %0 {offsets = [1, 0], sizes = [1, 16], strides = [1, 1]} : vector<16x16xf32> to vector<1x16xf32>
    %10 = vector.extract_strided_slice %0 {offsets = [7, 0], sizes = [1, 16], strides = [1, 1]} : vector<16x16xf32> to vector<1x16xf32>
    %11 = arith.subf %9, %10 : vector<1x16xf32>
    %12 = arith.mulf %11, %3 : vector<1x16xf32>
    %13 = vector.extract_strided_slice %0 {offsets = [2, 0], sizes = [1, 16], strides = [1, 1]} : vector<16x16xf32> to vector<1x16xf32>
    %14 = vector.extract_strided_slice %0 {offsets = [8, 0], sizes = [1, 16], strides = [1, 1]} : vector<16x16xf32> to vector<1x16xf32>
    %15 = arith.subf %13, %14 : vector<1x16xf32>
    %16 = arith.mulf %15, %3 : vector<1x16xf32>
    %17 = arith.mulf %8, %8 : vector<1x16xf32>
    %18 = arith.mulf %12, %12 : vector<1x16xf32>
    %19 = arith.addf %17, %18 : vector<1x16xf32>
    %20 = arith.mulf %16, %16 : vector<1x16xf32>
    %21 = arith.addf %19, %20 : vector<1x16xf32>
    %22 = math.sqrt %21 : vector<1x16xf32>
    %23 = vector.extract_strided_slice %0 {offsets = [3, 0], sizes = [1, 16], strides = [1, 1]} : vector<16x16xf32> to vector<1x16xf32>
    %24 = vector.extract_strided_slice %0 {offsets = [9, 0], sizes = [1, 16], strides = [1, 1]} : vector<16x16xf32> to vector<1x16xf32>
    %25 = arith.subf %23, %24 : vector<1x16xf32>
    %26 = arith.mulf %25, %4 : vector<1x16xf32>
    %27 = vector.extract_strided_slice %0 {offsets = [4, 0], sizes = [1, 16], strides = [1, 1]} : vector<16x16xf32> to vector<1x16xf32>
    %28 = vector.extract_strided_slice %0 {offsets = [10, 0], sizes = [1, 16], strides = [1, 1]} : vector<16x16xf32> to vector<1x16xf32>
    %29 = arith.subf %27, %28 : vector<1x16xf32>
    %30 = arith.mulf %29, %4 : vector<1x16xf32>
    %31 = vector.extract_strided_slice %0 {offsets = [5, 0], sizes = [1, 16], strides = [1, 1]} : vector<16x16xf32> to vector<1x16xf32>
    %32 = vector.extract_strided_slice %0 {offsets = [11, 0], sizes = [1, 16], strides = [1, 1]} : vector<16x16xf32> to vector<1x16xf32>
    %33 = arith.subf %31, %32 : vector<1x16xf32>
    %34 = arith.mulf %33, %4 : vector<1x16xf32>
    %35 = arith.mulf %26, %26 : vector<1x16xf32>
    %36 = arith.mulf %30, %30 : vector<1x16xf32>
    %37 = arith.addf %35, %36 : vector<1x16xf32>
    %38 = arith.mulf %34, %34 : vector<1x16xf32>
    %39 = arith.addf %37, %38 : vector<1x16xf32>
    %40 = math.sqrt %39 : vector<1x16xf32>
    %41 = arith.mulf %1, %1 : vector<1x16xf32>
    %42 = arith.mulf %2, %2 : vector<1x16xf32>
    %43 = vector.extract_strided_slice %0 {offsets = [14, 0], sizes = [1, 16], strides = [1, 1]} : vector<16x16xf32> to vector<1x16xf32>
    %44 = vector.extract_strided_slice %0 {offsets = [15, 0], sizes = [1, 16], strides = [1, 1]} : vector<16x16xf32> to vector<1x16xf32>
    %cst = arith.constant 0.899999976 : f32
    %45 = vector.broadcast %cst : f32 to vector<1x16xf32>
    %46 = arith.mulf %45, %22 : vector<1x16xf32>
    %cst_1 = arith.constant 1.000000e-01 : f32
    %47 = vector.broadcast %cst_1 : f32 to vector<1x16xf32>
    %48 = arith.mulf %47, %41 : vector<1x16xf32>
    %49 = arith.addf %46, %48 : vector<1x16xf32>
    %cst_2 = arith.constant 0.899999976 : f32
    %50 = vector.broadcast %cst_2 : f32 to vector<1x16xf32>
    %51 = arith.mulf %50, %40 : vector<1x16xf32>
    %cst_3 = arith.constant 1.000000e-01 : f32
    %52 = vector.broadcast %cst_3 : f32 to vector<1x16xf32>
    %53 = arith.mulf %52, %42 : vector<1x16xf32>
    %54 = arith.addf %51, %53 : vector<1x16xf32>
    %55 = arith.mulf %49, %43 : vector<1x16xf32>
    %56 = arith.mulf %54, %44 : vector<1x16xf32>
    %57 = arith.addf %55, %56 : vector<1x16xf32>
    %58 = vector.shape_cast %57 : vector<1x16xf32> to vector<1x1x16xf32>
    %cst_4 = arith.constant dense<0.000000e+00> : vector<1xf32>
    %59 = vector.multi_reduction <add>, %58, %cst_4 [1, 2] : vector<1x1x16xf32> to vector<1xf32>
    %60 = vector.shape_cast %59 : vector<1xf32> to vector<1x1x1xf32>
    %61 = vector.extract %60[0, 0, 0] : f32 from vector<1x1x1xf32>
    %62 = arith.addf %43, %44 : vector<1x16xf32>
    %63 = vector.shape_cast %62 : vector<1x16xf32> to vector<1x1x16xf32>
    %cst_5 = arith.constant dense<0.000000e+00> : vector<1xf32>
    %64 = vector.multi_reduction <add>, %63, %cst_5 [1, 2] : vector<1x1x16xf32> to vector<1xf32>
    %65 = vector.shape_cast %64 : vector<1xf32> to vector<1x1x1xf32>
    %66 = vector.extract %65[0, 0, 0] : f32 from vector<1x1x1xf32>
    %67 = arith.divf %61, %66 : f32
    %c0_6 = arith.constant 0 : index
    %68 = memref.load %arg1[%c0_6] : memref<1xf32, #tpu.memory_space<smem>>
    memref.store %67, %arg1[%c0_6] : memref<1xf32, #tpu.memory_space<smem>>
    return
  }
}

</mosaic_0001>

<bundles_post_ra>
// kernel: tracknet_loss_pallas.1
= control target key start
LH: loop header
LB: loop body
LE: loop exit
PB: predicated region body
PF: predicated region fallthrough
CT: control target
= control target key end

     0   :  { %s190_s0 = inlined_call_operand.vmem [shape: f32[16,16], index: 0, kind: input, shape index: {}]   ;;  %s191_s1 = inlined_call_operand.hbm [shape: f32[1], index: 1, kind: output, shape index: {}]  }
   0x1   :  { %v10_v0 = vld [vmem:[%s190_s0 + $0x8] sm:$0xff] }
   0x2   :  { %6 = vsyncpa [#allocation3], 0  ;;  %141 = vrcp.f32 %v10_v0  ;;  %v9_v1 = vld [vmem:[%s190_s0] sm:$0xff]  ;;  %v24_v3 = vrot.slane %v10_v0, 6  ;;  %v69_v29 = vmul.f32 %v10_v0, %v10_v0  ;;  %v81_v45 = vrot.slane %v10_v0, 4  ;;  %s149_s15 = scalar_lea.hbm %s191_s1, 16 }
   0x3   :  { %v13_v2 = vrot.slane %v9_v1, 6  ;;  %v99_v46 = vrot.slane %v10_v0, 1  ;;  %vm88_vm4 = vcmask 122880   ;;  %p150_p0 = scmp.ne.s32.totalorder %s191_s1, %s149_s15  ;;  %p153_p1 = scmp.lt.u32.totalorder %s149_s15, %s191_s1 }
   0x4   :  { %v26_v5 = vsub.f32 %v9_v1, %v24_v3  ;;  %v71_v32 = vmul.f32 0.1, %v69_v29 }
   0x5   :  { %v15_v4 = vsub.f32 %v9_v1, %v13_v2  ;;  %v101_v51 = vadd.f32 %v99_v46, %v10_v0  ;;  %p155_p2 = pnand %p153_p1, %p150_p0 }
   0x6   :  { %v73_v38 = vrot.slane %v71_v32, 4  ;;  %v77_v41 = vrot.slane %v71_v32, 2 }
   0x7   :  { %v103_v54 = vrot.slane %v101_v51, 6 }
   0x9   :  { %v105_v56 = vsel %vm88_vm4, %v103_v54, 0.0 }
   0xc   :  { %v142_v6 = vpop.eup %141 }
   0xd   :  { %v17_v7 = vrot.slane %v142_v6, 4  ;;  %v20_v8 = vrot.slane %v142_v6, 3  ;;  %v27_v9 = vrot.slane %v142_v6, 2  ;;  %v48_v10 = vrot.slane %v142_v6, 1 }
   0xe   :  { %v51_v11 = vmul.f32 %v142_v6, %v26_v5 }
   0xf   :  { %v19_v12 = vmul.f32 %v17_v7, %v15_v4  ;;  %v22_v13 = vmul.f32 %v20_v8, %v15_v4  ;;  %v29_v14 = vmul.f32 %v27_v9, %v26_v5  ;;  %v50_v15 = vmul.f32 %v48_v10, %v26_v5 }
  0x10   :  { %v57_v16 = vmul.f32 %v51_v11, %v51_v11 }
  0x11   :  { %v30_v17 = vmul.f32 %v19_v12, %v19_v12  ;;  %v31_v18 = vmul.f32 %v22_v13, %v22_v13  ;;  %v36_v19 = vmul.f32 %v29_v14, %v29_v14  ;;  %v52_v20 = vmul.f32 %v50_v15, %v50_v15 }
  0x12   :  { %v59_v24 = vrot.slane %v57_v16, 2 }
  0x13   :  { %v33_v21 = vrot.slane %v31_v18, 1  ;;  %v38_v22 = vrot.slane %v36_v19, 2  ;;  %v54_v23 = vrot.slane %v52_v20, 1 }
  0x15   :  { %v35_v25 = vadd.f32 %v33_v21, %v30_v17  ;;  %v56_v26 = vadd.f32 %v54_v23, %v36_v19 }
  0x17   :  { %v40_v27 = vadd.f32 %v38_v22, %v35_v25  ;;  %v61_v28 = vadd.f32 %v59_v24, %v56_v26 }
  0x19   :  { %143 = vrsqrt.f32 %v40_v27  ;;  %vm43_vm0 = vcmp.eq.f32.partialorder %v40_v27, inf  ;;  %v46_v31 = vand.u32 2147483648, %v40_v27  ;;  %vm45_vm1 = vcmp.eq.f32.partialorder %v40_v27, 0.0 }
  0x1a   :  { %145 = vrsqrt.f32 %v61_v28  ;;  %vm64_vm2 = vcmp.eq.f32.partialorder %v61_v28, inf  ;;  %v67_v35 = vand.u32 2147483648, %v61_v28  ;;  %vm66_vm3 = vcmp.eq.f32.partialorder %v61_v28, 0.0 }
  0x23   :  { %v144_v30 = vpop.eup %143 }
  0x24   :  { %v146_v33 = vpop.eup %145  ;;  %v42_v34 = vmul.f32 %v144_v30, %v40_v27 }
  0x25   :  { %v63_v36 = vmul.f32 %v146_v33, %v61_v28 }
  0x26   :  { %v44_v37 = vsel %vm43_vm0, %v40_v27, %v42_v34 }
  0x27   :  { %v47_v39 = vsel %vm45_vm1, %v46_v31, %v44_v37  ;;  %v65_v40 = vsel %vm64_vm2, %v61_v28, %v63_v36 }
  0x28   :  { %v68_v42 = vsel %vm66_vm3, %v67_v35, %v65_v40  ;;  %v70_v43 = vmul.f32 0.9, %v47_v39 }
  0x29   :  { %v76_v44 = vmul.f32 0.9, %v68_v42 }
  0x2a   :  { %v75_v47 = vadd.f32 %v73_v38, %v70_v43 }
  0x2b   :  { %v79_v48 = vadd.f32 %v77_v41, %v76_v44 }
  0x2c   :  { %v80_v49 = vmul.f32 %v75_v47, %v24_v3 }
  0x2d   :  { %v83_v50 = vmul.f32 %v81_v45, %v79_v48 }
  0x2f   :  { %v85_v52 = vrot.slane %v83_v50, 3 }
  0x31   :  { %v87_v53 = vadd.f32 %v85_v52, %v80_v49 }
  0x33   :  { %v89_v55 = vsel %vm88_vm4, %v87_v53, 0.0 }
  0x34   :  { %90 = vadd.xlane.f32.xlu0 %v89_v55 }
  0x38   :  { %106 = vadd.xlane.f32.xlu0 %v105_v56 }
  0xc1   :  { %v91_v57 = vpop.xlane.xlu0 %90 }
  0xc2   :  { %v92_v58 = vrot.slane %v91_v57, 4 }
  0xc4   :  { %v93_v59 = vadd.f32 %v92_v58, %v91_v57 }
  0xc5   :  { %v107_v60 = vpop.xlane.xlu0 %106 }
  0xc6   :  { %v94_v61 = vrot.slane %v93_v59, 2  ;;  %v108_v62 = vrot.slane %v107_v60, 4 }
  0xc8   :  { %v109_v63 = vadd.f32 %v108_v62, %v107_v60  ;;  %v95_v1 = vadd.f32 %v94_v61, %v93_v59 }
  0xca   :  { %v110_v2 = vrot.slane %v109_v63, 2  ;;  %v96_v3 = vrot.slane %v95_v1, 1 }
  0xcc   :  { %v111_v4 = vadd.f32 %v110_v2, %v109_v63  ;;  %v97_v0 = vadd.f32 %v96_v3, %v95_v1 }
  0xce   :  { %134 = vpush %v97_v0  ;;  %v112_v5 = vrot.slane %v111_v4, 1 }
  0xd0   :  { %v113_v6 = vadd.f32 %v112_v5, %v111_v4 }
  0xd2   :  { %136 = vpush %v113_v6 }
  0xff   :  { %s135_s0 = spop %134 }
 0x103   :  { %s137_s10 = spop %136 }
 0x104   :  { %v115_v7 = vstv %s137_s10 }
 0x105   :  { %147 = vrcp.f32 %v115_v7 }
 0x10f   :  { %v148_v8 = vpop.eup %147 }
 0x110   :  { %138 = vpush %v148_v8 }
 0x141   :  { %s139_s11 = spop %138 }
 0x142   :  { %s118_s12 = smul.f32 %s139_s11, %s135_s0 }
 0x144   :  { %120 = sst [smem:[#allocation2]] %s118_s12 }
 0x145   :  { %158 = shalt.err (!%p155_p2)
}
 0x146   :  { %s161_s20 = smov [#allocation2]  }
 0x147   :  { %128 = dma.smem_to_hbm %s161_s20, 16, %s191_s1, [#allocation3]  }
 0x148   :  { %159 = dma.done.wait [#allocation3], 16  }
 0x149   :  { %160 = vsyncadd [#allocation3], 4294967280 }
 0x14a   :  { %132 = sfence }
 0x14b   :  { %133 = vsyncpa [#allocation3], 1 }

</bundles_post_ra>
